<compile_context>
chip_gen: v5e
topology: v5e:2x2
jax: 0.10.0
libtpu: 0.0.40
codegen_flags: <defaults>
</compile_context>

<pallas_src>
import functools

import jax
import jax.numpy as jnp
from jax import lax
from jax.experimental import pallas as pl
from jax.experimental.pallas import tpu as pltpu

BN_EPS = 1e-5
_LANE = 128       # last-dim padding target (f32 lane width)
_SUBLANE = 8      # second-to-last-dim padding target (f32 sublane width)
_MIB = 1024 * 1024
_FUSED_VMEM_BUDGET = 40 * _MIB    # above this, "auto" switches to the tiled path


def _round_up(v, m):
    return (v + m - 1) // m * m


def _pad_2d(a, rows, cols):
    pr, pc = rows - a.shape[0], cols - a.shape[1]
    if pr == 0 and pc == 0:
        return a
    return jnp.pad(a, ((0, pr), (0, pc)))


def _nbytes(a):
    return a.size * a.dtype.itemsize


def _cparams(vmem_need_bytes, semantics=None):
    # Explicit scoped-VMEM limit (defaults: 16 MiB v5e / 32 MiB v6e,v7x).
    limit = int(min(max(2 * vmem_need_bytes, 32 * _MIB), 100 * _MIB))
    return pltpu.CompilerParams(dimension_semantics=semantics,
                                vmem_limit_bytes=limit)


# ----------------------------------------------------------------------------
# Fused path: whole batch resident in VMEM, single pallas_call (small/medium N)
# ----------------------------------------------------------------------------
def _fused_mlp_kernel(*refs, num_hidden, n_valid):
    """refs: x, (w_i, gb_i) * num_hidden, w_out, b_out, out.

      x    : [N_pad, D0_pad]  f32
      w_i  : [Din_pad, H_pad] f32/bf16  (pre-transposed; no bias: BN absorbs it)
      gb_i : [2, H_pad]       f32       (row 0 = gamma, row 1 = beta)
      w_out: [Hin_pad, O_pad] f32/bf16,  b_out: [1, O_pad] f32
    """
    x_ref, o_ref = refs[0], refs[-1]
    h = x_ref[...]
    n_pad = h.shape[0]
    inv_n = 1.0 / n_valid

    mask = None
    if n_pad != n_valid and num_hidden > 1:
        rows = lax.broadcasted_iota(jnp.int32, (n_pad, 1), 0)
        mask = (rows < n_valid).astype(jnp.float32)

    for i in range(num_hidden):
        w = refs[1 + 2 * i][...]
        gb = refs[2 + 2 * i]
        # Linear (no bias) -> straight MXU matmul, f32 accumulate.
        h = jnp.dot(h.astype(w.dtype), w, preferred_element_type=jnp.float32)
        # BatchNorm1d training-mode stats; padded rows are exactly zero so no mask
        # is needed on the statistics path.  Affine folded into one FMA, ReLU fused.
        mean = jnp.sum(h, axis=0, keepdims=True) * inv_n
        mean_sq = jnp.sum(h * h, axis=0, keepdims=True) * inv_n
        var = jnp.maximum(mean_sq - mean * mean, 0.0)     # f32 cancellation guard
        scale = gb[0:1, :] * lax.rsqrt(var + BN_EPS)      # EUP rsqrt
        shift = gb[1:2, :] - mean * scale
        h = jnp.maximum(h * scale + shift, 0.0)
        # Re-zero padded rows only if another BN layer will consume these stats.
        if mask is not None and i < num_hidden - 1:
            h = h * mask

    w_out = refs[1 + 2 * num_hidden][...]
    b_out = refs[2 + 2 * num_hidden][...]
    o_ref[...] = jnp.dot(h.astype(w_out.dtype), w_out,
                         preferred_element_type=jnp.float32) + b_out


def _run_fused(xp, kp, n_valid):
    num_hidden = len(kp["ws"])
    args = [xp]
    for w, gb in zip(kp["ws"], kp["gb"]):
        args += [w, gb]
    args += [kp["w_out"], kp["b_out"]]

    n_pad = xp.shape[0]
    out_pad = kp["w_out"].shape[1]

    flops = 2 * n_pad * sum(w.shape[0] * w.shape[1] for w in kp["ws"])
    flops += 2 * n_pad * kp["w_out"].shape[0] * out_pad
    bytes_accessed = sum(_nbytes(a) for a in args) + n_pad * out_pad * 4
    transcendentals = sum(w.shape[1] for w in kp["ws"])
    widths = [xp.shape[1], out_pad] + [w.shape[1] for w in kp["ws"]]
    vmem_need = bytes_accessed + 2 * n_pad * max(widths) * 4

    kernel = functools.partial(_fused_mlp_kernel, num_hidden=num_hidden,
                               n_valid=n_valid)
    return pl.pallas_call(
        kernel,
        out_shape=jax.ShapeDtypeStruct((n_pad, out_pad), jnp.float32),
        in_specs=[pl.BlockSpec(memory_space=pltpu.MemorySpace.VMEM)] * len(args),
        out_specs=pl.BlockSpec(memory_space=pltpu.MemorySpace.VMEM),
        compiler_params=_cparams(vmem_need),
        cost_estimate=pl.CostEstimate(flops=flops, transcendentals=transcendentals,
                                      bytes_accessed=bytes_accessed),
    )(*args)


# ----------------------------------------------------------------------------
# Tiled path: grid over N ("parallel"), two-pass BN per layer (graph-scale N)
# ----------------------------------------------------------------------------
def _linear_tile_kernel(x_ref, w_ref, b_ref, o_ref):
    w = w_ref[...]
    o_ref[...] = jnp.dot(x_ref[...].astype(w.dtype), w,
                         preferred_element_type=jnp.float32) + b_ref[...]


def _first_tile_kernel(x_ref, w_ref, h_ref, ps_ref):
    """Layer-1 matmul (no bias) + per-tile partial BN sums (stats pass 1)."""
    w = w_ref[...]
    h = jnp.dot(x_ref[...].astype(w.dtype), w, preferred_element_type=jnp.float32)
    h_ref[...] = h
    s = jnp.sum(h, axis=0, keepdims=True)
    sq = jnp.sum(h * h, axis=0, keepdims=True)
    ps_ref[...] = jnp.concatenate([s, sq], axis=0).reshape(1, 2, -1)


def _bn_relu(h, stats, gb, inv_n):
    mean = stats[0:1, :] * inv_n
    var = jnp.maximum(stats[1:2, :] * inv_n - mean * mean, 0.0)
    scale = gb[0:1, :] * lax.rsqrt(var + BN_EPS)
    shift = gb[1:2, :] - mean * scale
    return jnp.maximum(h * scale + shift, 0.0)


def _mid_tile_kernel(h_ref, stats_ref, gb_ref, w_ref, hn_ref, ps_ref,
                     *, inv_n, n_valid, tm, masked):
    """BN+ReLU of previous layer (pass 2) fused with this layer's matmul and
    the partial sums for the next BN (pass 1)."""
    a = _bn_relu(h_ref[...], stats_ref[...], gb_ref[...], inv_n)
    if masked:   # keep padded batch rows exactly zero so downstream stats stay clean
        rows = pl.program_id(0) * tm + lax.broadcasted_iota(jnp.int32, (tm, 1), 0)
        a = a * (rows < n_valid).astype(jnp.float32)
    w = w_ref[...]
    hn = jnp.dot(a.astype(w.dtype), w, preferred_element_type=jnp.float32)
    hn_ref[...] = hn
    s = jnp.sum(hn, axis=0, keepdims=True)
    sq = jnp.sum(hn * hn, axis=0, keepdims=True)
    ps_ref[...] = jnp.concatenate([s, sq], axis=0).reshape(1, 2, -1)


def _last_tile_kernel(h_ref, stats_ref, gb_ref, w_ref, b_ref, o_ref, *, inv_n):
    a = _bn_relu(h_ref[...], stats_ref[...], gb_ref[...], inv_n)
    w = w_ref[...]
    o_ref[...] = jnp.dot(a.astype(w.dtype), w,
                         preferred_element_type=jnp.float32) + b_ref[...]


def _run_tiled(xp, kp, n_valid, tm):
    num_hidden = len(kp["ws"])
    n_pad = xp.shape[0]
    nt = n_pad // tm
    inv_n = 1.0 / n_valid
    masked = n_pad != n_valid
    psem = ("parallel",)

    w_out, b_out = kp["w_out"], kp["b_out"]
    out_pad = w_out.shape[1]

    if num_hidden == 0:   # pure Linear (num_layers == 1)
        d_pad = w_out.shape[0]
        flops = 2 * n_pad * d_pad * out_pad
        bytes_acc = _nbytes(xp) + _nbytes(w_out) + _nbytes(b_out) + n_pad * out_pad * 4
        vmem = 2 * (tm * d_pad + tm * out_pad) * 4 + _nbytes(w_out) + _nbytes(b_out)
        return pl.pallas_call(
            _linear_tile_kernel,
            grid=(nt,),
            in_specs=[pl.BlockSpec((tm, d_pad), lambda t: (t, 0)),
                      pl.BlockSpec((d_pad, out_pad), lambda t: (0, 0)),
                      pl.BlockSpec((1, out_pad), lambda t: (0, 0))],
            out_specs=pl.BlockSpec((tm, out_pad), lambda t: (t, 0)),
            out_shape=jax.ShapeDtypeStruct((n_pad, out_pad), jnp.float32),
            compiler_params=_cparams(vmem, psem),
            cost_estimate=pl.CostEstimate(flops=flops, transcendentals=0,
                                          bytes_accessed=bytes_acc),
        )(xp, w_out, b_out)

    # ---- layer 1: matmul + partial BN sums -------------------------------
    w1 = kp["ws"][0]
    d0_pad, h1_pad = w1.shape
    flops = 2 * n_pad * d0_pad * h1_pad
    bytes_acc = _nbytes(xp) + _nbytes(w1) + n_pad * h1_pad * 4 + nt * 2 * h1_pad * 4
    vmem = 2 * (tm * d0_pad + tm * h1_pad + 2 * h1_pad) * 4 + _nbytes(w1)
    h, ps = pl.pallas_call(
        _first_tile_kernel,
        grid=(nt,),
        in_specs=[pl.BlockSpec((tm, d0_pad), lambda t: (t, 0)),
                  pl.BlockSpec((d0_pad, h1_pad), lambda t: (0, 0))],
        out_specs=(pl.BlockSpec((tm, h1_pad), lambda t: (t, 0)),
                   pl.BlockSpec((1, 2, h1_pad), lambda t: (t, 0, 0))),
        out_shape=(jax.ShapeDtypeStruct((n_pad, h1_pad), jnp.float32),
                   jax.ShapeDtypeStruct((nt, 2, h1_pad), jnp.float32)),
        compiler_params=_cparams(vmem, psem),
        cost_estimate=pl.CostEstimate(flops=flops, transcendentals=0,
                                      bytes_accessed=bytes_acc),
    )(xp, w1)
    stats = jnp.sum(ps, axis=0)          # (2, H_pad): tiny XLA reduce between calls

    # ---- layers 2..num_hidden: BN+ReLU (pass 2) fused with next matmul ----
    for li in range(1, num_hidden):
        w = kp["ws"][li]
        gb = kp["gb"][li - 1]
        hin_pad, hout_pad = w.shape
        kern = functools.partial(_mid_tile_kernel, inv_n=inv_n, n_valid=n_valid,
                                 tm=tm, masked=masked)
        flops = 2 * n_pad * hin_pad * hout_pad
        bytes_acc = (n_pad * hin_pad * 4 + _nbytes(w) + _nbytes(gb) + _nbytes(stats)
                     + n_pad * hout_pad * 4 + nt * 2 * hout_pad * 4)
        vmem = (2 * (tm * hin_pad + tm * hout_pad + 2 * hout_pad) * 4
                + _nbytes(w) + _nbytes(gb) + _nbytes(stats))
        h, ps = pl.pallas_call(
            kern,
            grid=(nt,),
            in_specs=[pl.BlockSpec((tm, hin_pad), lambda t: (t, 0)),
                      pl.BlockSpec((2, hin_pad), lambda t: (0, 0)),
                      pl.BlockSpec((2, hin_pad), lambda t: (0, 0)),
                      pl.BlockSpec((hin_pad, hout_pad), lambda t: (0, 0))],
            out_specs=(pl.BlockSpec((tm, hout_pad), lambda t: (t, 0)),
                       pl.BlockSpec((1, 2, hout_pad), lambda t: (t, 0, 0))),
            out_shape=(jax.ShapeDtypeStruct((n_pad, hout_pad), jnp.float32),
                       jax.ShapeDtypeStruct((nt, 2, hout_pad), jnp.float32)),
            compiler_params=_cparams(vmem, psem),
            cost_estimate=pl.CostEstimate(flops=flops, transcendentals=hout_pad,
                                          bytes_accessed=bytes_acc),
        )(h, stats, gb, w)
        stats = jnp.sum(ps, axis=0)

    # ---- last hidden BN+ReLU fused with the final Linear ------------------
    gb = kp["gb"][num_hidden - 1]
    hin_pad = w_out.shape[0]
    kern = functools.partial(_last_tile_kernel, inv_n=inv_n)
    flops = 2 * n_pad * hin_pad * out_pad
    bytes_acc = (n_pad * hin_pad * 4 + _nbytes(w_out) + _nbytes(b_out) + _nbytes(gb)
                 + _nbytes(stats) + n_pad * out_pad * 4)
    vmem = (2 * (tm * hin_pad + tm * out_pad) * 4
            + _nbytes(w_out) + _nbytes(b_out) + _nbytes(gb) + _nbytes(stats))
    return pl.pallas_call(
        kern,
        grid=(nt,),
        in_specs=[pl.BlockSpec((tm, hin_pad), lambda t: (t, 0)),
                  pl.BlockSpec((2, hin_pad), lambda t: (0, 0)),
                  pl.BlockSpec((2, hin_pad), lambda t: (0, 0)),
                  pl.BlockSpec((hin_pad, out_pad), lambda t: (0, 0)),
                  pl.BlockSpec((1, out_pad), lambda t: (0, 0))],
        out_specs=pl.BlockSpec((tm, out_pad), lambda t: (t, 0)),
        out_shape=jax.ShapeDtypeStruct((n_pad, out_pad), jnp.float32),
        compiler_params=_cparams(vmem, psem),
        cost_estimate=pl.CostEstimate(flops=flops, transcendentals=out_pad,
                                      bytes_accessed=bytes_acc),
    )(h, stats, gb, w_out, b_out)


# ----------------------------------------------------------------------------
# Wrapper / params
# ----------------------------------------------------------------------------
def prepare_params(params, num_layers, matmul_dtype=jnp.float32):
    """One-time transform (call once, outside the per-step forward):
    transpose weights to [Din, Dout], pad to lane/sublane-friendly shapes, pack
    (gamma, beta) into a single (2, H_pad) array per layer, and optionally cast
    matmul operands to bf16 (BN/affine params stay f32).
    Hidden-layer biases are dropped: training-mode BatchNorm makes them a no-op."""
    num_hidden = num_layers - 1
    linears = params["linears"]
    kp = {"ws": [], "gb": []}
    for i in range(num_hidden):
        w, _b = linears[i]                       # bias intentionally dropped
        gamma, beta = params["bn"][i]
        dout, din = w.shape
        din_p, dout_p = _round_up(din, _LANE), _round_up(dout, _LANE)
        kp["ws"].append(_pad_2d(w.T.astype(jnp.float32), din_p, dout_p)
                        .astype(matmul_dtype))
        gb = jnp.stack([gamma, beta], axis=0).astype(jnp.float32)
        kp["gb"].append(_pad_2d(gb, 2, dout_p))
    w_last, b_last = linears[-1]
    dout, din = w_last.shape
    din_p, dout_p = _round_up(din, _LANE), _round_up(dout, _LANE)
    kp["w_out"] = _pad_2d(w_last.T.astype(jnp.float32), din_p, dout_p).astype(matmul_dtype)
    kp["b_out"] = _pad_2d(b_last.reshape(1, -1).astype(jnp.float32), 1, dout_p)
    return kp


@functools.partial(jax.jit, static_argnames=("out_dim", "mode", "tile_n"))
def mlp_forward(x, kparams, out_dim, mode="auto", tile_n=256):
    """Forward pass matching the PyTorch MLP (training-mode BatchNorm1d)."""
    n, _ = x.shape
    num_hidden = len(kparams["ws"])
    d0_pad = kparams["ws"][0].shape[0] if num_hidden else kparams["w_out"].shape[0]

    if mode == "auto":
        n_pad8 = _round_up(max(n, _SUBLANE), _SUBLANE)
        widths = ([w.shape[1] for w in kparams["ws"]]
                  + [kparams["w_out"].shape[1], d0_pad])
        weight_bytes = (sum(_nbytes(w) + _nbytes(g)
                            for w, g in zip(kparams["ws"], kparams["gb"]))
                        + _nbytes(kparams["w_out"]) + _nbytes(kparams["b_out"]))
        need = (weight_bytes + n_pad8 * d0_pad * 4
                + n_pad8 * kparams["w_out"].shape[1] * 4
                + 2 * n_pad8 * max(widths) * 4)
        mode = "fused" if need <= _FUSED_VMEM_BUDGET else "tiled"

    if mode == "fused":
        n_pad = _round_up(max(n, _SUBLANE), _SUBLANE)
        xp = _pad_2d(x.astype(jnp.float32), n_pad, d0_pad)
        out_p = _run_fused(xp, kparams, n)
    elif mode == "tiled":
        tm = _round_up(min(tile_n, max(n, 1)), _SUBLANE)
        n_pad = _round_up(n, tm)
        xp = _pad_2d(x.astype(jnp.float32), n_pad, d0_pad)
        out_p = _run_tiled(xp, kparams, n, tm)
    else:
        raise ValueError(f"unknown mode: {mode}")
    return out_p[:n, :out_dim]


def init_mlp_params(key, num_layers, input_dim, hidden_dim, output_dim):
    """Deterministic init mimicking PyTorch defaults (uniform(-1/sqrt(fan_in), ...))."""
    if num_layers < 1:
        raise ValueError("number of layers should be positive!")
    params = {"linears": [], "bn": []}

    def linear_init(k, din, dout):
        kw, kb = jax.random.split(k)
        bound = 1.0 / float(jnp.sqrt(din))
        w = jax.random.uniform(kw, (dout, din), jnp.float32, -bound, bound)
        b = jax.random.uniform(kb, (dout,), jnp.float32, -bound, bound)
        return w, b

    if num_layers == 1:
        key, sub = jax.random.split(key)
        params["linears"].append(linear_init(sub, input_dim, output_dim))
        return params

    dims = [input_dim] + [hidden_dim] * (num_layers - 1) + [output_dim]
    for i in range(num_layers):
        key, sub = jax.random.split(key)
        params["linears"].append(linear_init(sub, dims[i], dims[i + 1]))
    for _ in range(num_layers - 1):
        params["bn"].append((jnp.ones((hidden_dim,), jnp.float32),
                             jnp.zeros((hidden_dim,), jnp.float32)))
    return params


def _reference_forward(x, params, num_layers):
    """Pure-JAX reference reproducing the PyTorch forward (training-mode BN, with biases)."""
    if num_layers == 1:
        w, b = params["linears"][0]
        return x @ w.T + b
    h = x
    for i in range(num_layers - 1):
        w, b = params["linears"][i]
        gamma, beta = params["bn"][i]
        h = h @ w.T + b
        mean = jnp.mean(h, axis=0, keepdims=True)
        var = jnp.mean((h - mean) ** 2, axis=0, keepdims=True)
        h = (h - mean) / jnp.sqrt(var + BN_EPS)
        h = jnp.maximum(h * gamma + beta, 0.0)
    w, b = params["linears"][-1]
    return h @ w.T + b


if __name__ == "__main__":
    key = jax.random.PRNGKey(0)
    IN_FEATURES, HIDDEN_FEATURES, OUT_DIM = 16, 32, 8
    k_p, k_x, k_xt, k_p1, k_x1 = jax.random.split(key, 5)

    # ---- 3-layer MLP (GIN apply_func style: Linear->BN->ReLU x2 -> Linear) ----
    params = init_mlp_params(k_p, 3, IN_FEATURES, HIDDEN_FEATURES, OUT_DIM)
    kparams = prepare_params(params, 3)              # one-time param transform

    x = jax.random.normal(k_x, (8, IN_FEATURES), jnp.float32)
    out = mlp_forward(x, kparams, out_dim=OUT_DIM, mode="fused")
    jax.block_until_ready(out)
    ref = _reference_forward(x, params, 3)
    assert out.shape == (8, OUT_DIM)
    assert jnp.allclose(out, ref, atol=1e-4, rtol=1e-4), "fused path mismatch"

    # ---- batch-tiled path (grid over N, two-pass BN), padded batch exercised ----
    x_big = jax.random.normal(k_xt, (50, IN_FEATURES), jnp.float32)
    out_t = mlp_forward(x_big, kparams, out_dim=OUT_DIM, mode="tiled", tile_n=16)
    jax.block_until_ready(out_t)
    ref_t = _reference_forward(x_big, params, 3)
    assert out_t.shape == (50, OUT_DIM)
    assert jnp.allclose(out_t, ref_t, atol=1e-4, rtol=1e-4), "tiled path mismatch"

    # ---- bf16 MXU-operand variant (v6e/v7x fast path; BN math stays f32) ----
    kparams_bf16 = prepare_params(params, 3, matmul_dtype=jnp.bfloat16)
    out_b = mlp_forward(x, kparams_bf16, out_dim=OUT_DIM, mode="fused")
    jax.block_until_ready(out_b)
    assert out_b.shape == (8, OUT_DIM)
    assert bool(jnp.all(jnp.isfinite(out_b)))
    assert float(jnp.max(jnp.abs(out_b - ref))) < 0.5, "bf16 path diverged"

    # ---- num_layers == 1 pure-Linear branch (MLP(1, ...) / self.final) ----
    params1 = init_mlp_params(k_p1, 1, HIDDEN_FEATURES, HIDDEN_FEATURES, 2)
    kparams1 = prepare_params(params1, 1)
    x1 = jax.random.normal(k_x1, (16, HIDDEN_FEATURES), jnp.float32)
    out1 = mlp_forward(x1, kparams1, out_dim=2, mode="auto")
    jax.block_until_ready(out1)
    ref1 = _reference_forward(x1, params1, 1)
    assert out1.shape == (16, 2)
    assert jnp.allclose(out1, ref1, atol=1e-4, rtol=1e-4), "1-layer fused mismatch"

    out1_t = mlp_forward(x1, kparams1, out_dim=2, mode="tiled", tile_n=8)
    jax.block_until_ready(out1_t)
    assert jnp.allclose(out1_t, ref1, atol=1e-4, rtol=1e-4), "1-layer tiled mismatch"

    print("KERNEL_OK")
</pallas_src>

<mosaic_0001>
module attributes {stable_mosaic.version = 11 : i64} {
  func.func @_fused_mlp_kernel(%arg0: memref<8x128xf32, #tpu.memory_space<vmem>>, %arg1: memref<128x128xf32, #tpu.memory_space<vmem>>, %arg2: memref<2x128xf32, #tpu.memory_space<vmem>>, %arg3: memref<128x128xf32, #tpu.memory_space<vmem>>, %arg4: memref<2x128xf32, #tpu.memory_space<vmem>>, %arg5: memref<128x128xf32, #tpu.memory_space<vmem>>, %arg6: memref<1x128xf32, #tpu.memory_space<vmem>>, %arg7: memref<8x128xf32, #tpu.memory_space<vmem>>) attributes {dimension_semantics = [], scalar_prefetch = 0 : i64, scratch_operands = 0 : i64, tpu.core_type = #tpu.core_type<tc>} {
    %c0 = arith.constant 0 : index
    %c0_0 = arith.constant 0 : index
    %0 = vector.load %arg0[%c0, %c0_0] : memref<8x128xf32, #tpu.memory_space<vmem>>, vector<8x128xf32>
    %c0_1 = arith.constant 0 : index
    %c0_2 = arith.constant 0 : index
    %1 = vector.load %arg1[%c0_1, %c0_2] : memref<128x128xf32, #tpu.memory_space<vmem>>, vector<128x128xf32>
    %cst = arith.constant dense<0.000000e+00> : vector<8x128xf32>
    %2 = tpu.matmul %0, %1, %cst {dimension_numbers = #tpu.dot_dimension_numbers<[1], [0], [0], [1], [0, 0, 1, 1], [], []>} : vector<8x128xf32>, vector<128x128xf32>, vector<8x128xf32> -> vector<8x128xf32>
    %cst_3 = arith.constant dense<0.000000e+00> : vector<128xf32>
    %3 = vector.multi_reduction <add>, %2, %cst_3 [0] : vector<8x128xf32> to vector<128xf32>
    %4 = vector.shape_cast %3 : vector<128xf32> to vector<1x128xf32>
    %cst_4 = arith.constant 1.250000e-01 : f32
    %5 = vector.broadcast %cst_4 : f32 to vector<1x128xf32>
    %6 = arith.mulf %4, %5 : vector<1x128xf32>
    %7 = arith.mulf %2, %2 : vector<8x128xf32>
    %cst_5 = arith.constant dense<0.000000e+00> : vector<128xf32>
    %8 = vector.multi_reduction <add>, %7, %cst_5 [0] : vector<8x128xf32> to vector<128xf32>
    %9 = vector.shape_cast %8 : vector<128xf32> to vector<1x128xf32>
    %cst_6 = arith.constant 1.250000e-01 : f32
    %10 = vector.broadcast %cst_6 : f32 to vector<1x128xf32>
    %11 = arith.mulf %9, %10 : vector<1x128xf32>
    %12 = arith.mulf %6, %6 : vector<1x128xf32>
    %13 = arith.subf %11, %12 : vector<1x128xf32>
    %cst_7 = arith.constant 0.000000e+00 : f32
    %14 = vector.broadcast %cst_7 : f32 to vector<1x128xf32>
    %15 = arith.maximumf %13, %14 : vector<1x128xf32>
    %c0_8 = arith.constant 0 : index
    %c0_9 = arith.constant 0 : index
    %16 = vector.load %arg2[%c0_8, %c0_9] : memref<2x128xf32, #tpu.memory_space<vmem>>, vector<1x128xf32>
    %cst_10 = arith.constant 9.99999974E-6 : f32
    %17 = vector.broadcast %cst_10 : f32 to vector<1x128xf32>
    %18 = arith.addf %15, %17 : vector<1x128xf32>
    %19 = math.rsqrt %18 : vector<1x128xf32>
    %20 = arith.mulf %16, %19 : vector<1x128xf32>
    %c1 = arith.constant 1 : index
    %c0_11 = arith.constant 0 : index
    %21 = vector.load %arg2[%c1, %c0_11] : memref<2x128xf32, #tpu.memory_space<vmem>>, vector<1x128xf32>
    %22 = arith.mulf %6, %20 : vector<1x128xf32>
    %23 = arith.subf %21, %22 : vector<1x128xf32>
    %24 = vector.broadcast %20 : vector<1x128xf32> to vector<8x128xf32>
    %25 = arith.mulf %2, %24 : vector<8x128xf32>
    %26 = vector.broadcast %23 : vector<1x128xf32> to vector<8x128xf32>
    %27 = arith.addf %25, %26 : vector<8x128xf32>
    %cst_12 = arith.constant 0.000000e+00 : f32
    %28 = vector.broadcast %cst_12 : f32 to vector<8x128xf32>
    %29 = arith.maximumf %27, %28 : vector<8x128xf32>
    %c0_13 = arith.constant 0 : index
    %c0_14 = arith.constant 0 : index
    %30 = vector.load %arg3[%c0_13, %c0_14] : memref<128x128xf32, #tpu.memory_space<vmem>>, vector<128x128xf32>
    %cst_15 = arith.constant dense<0.000000e+00> : vector<8x128xf32>
    %31 = tpu.matmul %29, %30, %cst_15 {dimension_numbers = #tpu.dot_dimension_numbers<[1], [0], [0], [1], [0, 0, 1, 1], [], []>} : vector<8x128xf32>, vector<128x128xf32>, vector<8x128xf32> -> vector<8x128xf32>
    %cst_16 = arith.constant dense<0.000000e+00> : vector<128xf32>
    %32 = vector.multi_reduction <add>, %31, %cst_16 [0] : vector<8x128xf32> to vector<128xf32>
    %33 = vector.shape_cast %32 : vector<128xf32> to vector<1x128xf32>
    %cst_17 = arith.constant 1.250000e-01 : f32
    %34 = vector.broadcast %cst_17 : f32 to vector<1x128xf32>
    %35 = arith.mulf %33, %34 : vector<1x128xf32>
    %36 = arith.mulf %31, %31 : vector<8x128xf32>
    %cst_18 = arith.constant dense<0.000000e+00> : vector<128xf32>
    %37 = vector.multi_reduction <add>, %36, %cst_18 [0] : vector<8x128xf32> to vector<128xf32>
    %38 = vector.shape_cast %37 : vector<128xf32> to vector<1x128xf32>
    %cst_19 = arith.constant 1.250000e-01 : f32
    %39 = vector.broadcast %cst_19 : f32 to vector<1x128xf32>
    %40 = arith.mulf %38, %39 : vector<1x128xf32>
    %41 = arith.mulf %35, %35 : vector<1x128xf32>
    %42 = arith.subf %40, %41 : vector<1x128xf32>
    %cst_20 = arith.constant 0.000000e+00 : f32
    %43 = vector.broadcast %cst_20 : f32 to vector<1x128xf32>
    %44 = arith.maximumf %42, %43 : vector<1x128xf32>
    %c0_21 = arith.constant 0 : index
    %c0_22 = arith.constant 0 : index
    %45 = vector.load %arg4[%c0_21, %c0_22] : memref<2x128xf32, #tpu.memory_space<vmem>>, vector<1x128xf32>
    %cst_23 = arith.constant 9.99999974E-6 : f32
    %46 = vector.broadcast %cst_23 : f32 to vector<1x128xf32>
    %47 = arith.addf %44, %46 : vector<1x128xf32>
    %48 = math.rsqrt %47 : vector<1x128xf32>
    %49 = arith.mulf %45, %48 : vector<1x128xf32>
    %c1_24 = arith.constant 1 : index
    %c0_25 = arith.constant 0 : index
    %50 = vector.load %arg4[%c1_24, %c0_25] : memref<2x128xf32, #tpu.memory_space<vmem>>, vector<1x128xf32>
    %51 = arith.mulf %35, %49 : vector<1x128xf32>
    %52 = arith.subf %50, %51 : vector<1x128xf32>
    %53 = vector.broadcast %49 : vector<1x128xf32> to vector<8x128xf32>
    %54 = arith.mulf %31, %53 : vector<8x128xf32>
    %55 = vector.broadcast %52 : vector<1x128xf32> to vector<8x128xf32>
    %56 = arith.addf %54, %55 : vector<8x128xf32>
    %cst_26 = arith.constant 0.000000e+00 : f32
    %57 = vector.broadcast %cst_26 : f32 to vector<8x128xf32>
    %58 = arith.maximumf %56, %57 : vector<8x128xf32>
    %c0_27 = arith.constant 0 : index
    %c0_28 = arith.constant 0 : index
    %59 = vector.load %arg5[%c0_27, %c0_28] : memref<128x128xf32, #tpu.memory_space<vmem>>, vector<128x128xf32>
    %c0_29 = arith.constant 0 : index
    %c0_30 = arith.constant 0 : index
    %60 = vector.load %arg6[%c0_29, %c0_30] : memref<1x128xf32, #tpu.memory_space<vmem>>, vector<1x128xf32>
    %cst_31 = arith.constant dense<0.000000e+00> : vector<8x128xf32>
    %61 = tpu.matmul %58, %59, %cst_31 {dimension_numbers = #tpu.dot_dimension_numbers<[1], [0], [0], [1], [0, 0, 1, 1], [], []>} : vector<8x128xf32>, vector<128x128xf32>, vector<8x128xf32> -> vector<8x128xf32>
    %62 = vector.broadcast %60 : vector<1x128xf32> to vector<8x128xf32>
    %63 = arith.addf %61, %62 : vector<8x128xf32>
    %c0_32 = arith.constant 0 : index
    %c0_33 = arith.constant 0 : index
    %64 = vector.load %arg7[%c0_32, %c0_33] : memref<8x128xf32, #tpu.memory_space<vmem>>, vector<8x128xf32>
    tpu.vector_store %arg7[%c0_32, %c0_33], %63 {strides = array<i32>} : memref<8x128xf32, #tpu.memory_space<vmem>>, vector<8x128xf32>,
    return
  }
}

</mosaic_0001>

<bundles_post_ra>
// kernel: mlp_forward.1
= control target key start
LH: loop header
LB: loop body
LE: loop exit
PB: predicated region body
PF: predicated region fallthrough
CT: control target
= control target key end

     0   :  { %12 = vsyncpa [#allocation3], 0  ;;  %s473_s0 = inlined_call_operand.vmem [shape: f32[8,128], index: 0, kind: input, shape index: {}]   ;;  %s474_s1 = inlined_call_operand.hbm [shape: f32[128,128], index: 1, kind: input, shape index: {}]   ;;  %s475_s2 = inlined_call_operand.vmem [shape: f32[2,128], index: 2, kind: input, shape index: {}]   ;;  %s476_s3 = inlined_call_operand.hbm [shape: f32[128,128], index: 3, kind: input, shape index: {}]   ;;  %s477_s4 = inlined_call_operand.vmem [shape: f32[2,128], index: 4, kind: input, shape index: {}]   ;;  %s478_s5 = inlined_call_operand.hbm [shape: f32[128,128], index: 5, kind: input, shape index: {}]   ;;  %s479_s6 = inlined_call_operand.vmem [shape: f32[1,128], index: 6, kind: input, shape index: {}]   ;;  %s480_s7 = inlined_call_operand.hbm [shape: f32[8,128], index: 7, kind: output, shape index: {}]  }
   0x1   :  { %13 = vsyncpa [#allocation6], 0 }
   0x2   :  { %14 = vsyncpa [#allocation4], 0  ;;  %s36_s26 = sshll.u32 %s476_s3, 4  ;;  %s397_s27 = smov [#allocation5]   ;;  %s37_s26 = int_to_ptr.hbm [resolvable:$true] %s36_s26 }
   0x3   :  { %s38_s28 = sshll.u32 %s397_s27, 4  ;;  %s21_s8 = sshll.u32 %s474_s1, 4  ;;  %s39_s28 = int_to_ptr.vmem [resolvable:$true] %s38_s28  ;;  %s22_s8 = int_to_ptr.hbm [resolvable:$true] %s21_s8 }
   0x4   :  { %s398_s9 = smov 128   ;;  %s399_s10 = smov 8  }
   0x5   :  { %44 = dma.hbm_to_vmem [thread:$0]  %s37_s26, 2048, %s39_s28, [#allocation6], %s398_s9, %s398_s9, %s399_s10  }
   0x6   :  { %s400_s11 = smov [#allocation2]   ;;  %s51_s15 = sshll.u32 %s478_s5, 4  ;;  %s52_s15 = int_to_ptr.hbm [resolvable:$true] %s51_s15 }
   0x7   :  { %s23_s12 = sshll.u32 %s400_s11, 4  ;;  %s401_s3 = smov [#allocation7]   ;;  %s24_s12 = int_to_ptr.vmem [resolvable:$true] %s23_s12 }
   0x8   :  { %29 = dma.hbm_to_vmem [thread:$0]  %s22_s8, 2048, %s24_s12, [#allocation3], %s398_s9, %s398_s9, %s399_s10  }
   0x9   :  { %s53_s16 = sshll.u32 %s401_s3, 4  ;;  %s54_s16 = int_to_ptr.vmem [resolvable:$true] %s53_s16 }
   0xa   :  { %59 = dma.hbm_to_vmem [thread:$0]  %s52_s15, 2048, %s54_s16, [#allocation6], %s398_s9, %s398_s9, %s399_s10  }
   0xb   :  { %391 = dma.done.wait [#allocation3], 2048  }
   0xc   :  { %392 = vsyncadd [#allocation3], 4294965248 }
   0xd   :  { %393 = dma.done.wait [#allocation6], 4096  }
   0xe   :  { %394 = vsyncadd [#allocation6], 4294963200  ;;  %v90_v0 = vld [vmem:[#allocation2 + $0x78] sm:$0xff]  ;;  %v89_v1 = vld [vmem:[#allocation2 + $0x70] sm:$0xff]  ;;  %s402_s25 = smov [#allocation8]   ;;  %s273_s29 = sshll.u32 %s480_s7, 4  ;;  %s274_s29 = int_to_ptr.hbm [resolvable:$true] %s273_s29 }
   0xf   :  { %91 = vmatpush.msra.mxu0 %v90_v0  ;;  %v88_v2 = vld [vmem:[#allocation2 + $0x68] sm:$0xff]  ;;  %v87_v3 = vld [vmem:[#allocation2 + $0x60] sm:$0xff]  ;;  %v86_v4 = vld [vmem:[#allocation2 + $0x58] sm:$0xff]  ;;  %s271_s26 = sshll.u32 %s402_s25, 4  ;;  %s272_s26 = int_to_ptr.vmem [resolvable:$true] %s271_s26 }
  0x10   :  { %v85_v5 = vld [vmem:[#allocation2 + $0x50] sm:$0xff]  ;;  %v84_v6 = vld [vmem:[#allocation2 + $0x48] sm:$0xff]  ;;  %v83_v7 = vld [vmem:[#allocation2 + $0x40] sm:$0xff] }
  0x11   :  { %92 = vmatpush.msra.mxu0 %v89_v1  ;;  %v82_v8 = vld [vmem:[#allocation2 + $0x38] sm:$0xff]  ;;  %v81_v9 = vld [vmem:[#allocation2 + $0x30] sm:$0xff]  ;;  %v80_v10 = vld [vmem:[#allocation2 + $0x28] sm:$0xff] }
  0x12   :  { %v79_v11 = vld [vmem:[#allocation2 + $0x20] sm:$0xff]  ;;  %v78_v12 = vld [vmem:[#allocation2 + $0x18] sm:$0xff]  ;;  %v77_v13 = vld [vmem:[#allocation2 + $0x10] sm:$0xff] }
  0x13   :  { %93 = vmatpush.msra.mxu0 %v88_v2  ;;  %v76_v14 = vld [vmem:[#allocation2 + $0x8] sm:$0xff]  ;;  %v75_v15 = vld [vmem:[#allocation2] sm:$0xff]  ;;  %v165_v17 = vld [vmem:[#allocation5 + $0x78] sm:$0xff] }
  0x14   :  { %v74_v16 = vld [vmem:[%s473_s0] sm:$0xff]  ;;  %166 = vmatpush.msra.mxu1 %v165_v17  ;;  %v164_v18 = vld [vmem:[#allocation5 + $0x70] sm:$0xff]  ;;  %v163_v19 = vld [vmem:[#allocation5 + $0x68] sm:$0xff] }
  0x15   :  { %94 = vmatpush.msra.mxu0 %v87_v3  ;;  %v162_v20 = vld [vmem:[#allocation5 + $0x60] sm:$0xff]  ;;  %v161_v21 = vld [vmem:[#allocation5 + $0x58] sm:$0xff]  ;;  %v160_v22 = vld [vmem:[#allocation5 + $0x50] sm:$0xff] }
  0x16   :  { %167 = vmatpush.msra.mxu1 %v164_v18  ;;  %v159_v26 = vld [vmem:[#allocation5 + $0x48] sm:$0xff]  ;;  %v158_v29 = vld [vmem:[#allocation5 + $0x40] sm:$0xff]  ;;  %v157_v32 = vld [vmem:[#allocation5 + $0x38] sm:$0xff] }
  0x17   :  { %95 = vmatpush.msra.mxu0 %v86_v4  ;;  %v156_v35 = vld [vmem:[#allocation5 + $0x30] sm:$0xff]  ;;  %v155_v38 = vld [vmem:[#allocation5 + $0x28] sm:$0xff]  ;;  %v154_v41 = vld [vmem:[#allocation5 + $0x20] sm:$0xff] }
  0x18   :  { %168 = vmatpush.msra.mxu1 %v163_v19  ;;  %v153_v44 = vld [vmem:[#allocation5 + $0x18] sm:$0xff]  ;;  %v152_v45 = vld [vmem:[#allocation5 + $0x10] sm:$0xff]  ;;  %v151_v48 = vld [vmem:[#allocation5 + $0x8] sm:$0xff] }
  0x19   :  { %96 = vmatpush.msra.mxu0 %v85_v5  ;;  %v150_v50 = vld [vmem:[#allocation5] sm:$0xff] }
  0x1a   :  { %169 = vmatpush.msra.mxu1 %v162_v20  ;;  %v129_v58 = vld [vmem:[%s475_s2] sm:$0x1]  ;;  %v142_v62 = vld [vmem:[%s475_s2 + $0x1] sm:$0x1] }
  0x1b   :  { %97 = vmatpush.msra.mxu0 %v84_v6  ;;  %v240_v6 = vld [vmem:[#allocation7 + $0x78] sm:$0xff]  ;;  %v233_v18 = vld [vmem:[#allocation7 + $0x40] sm:$0xff] }
  0x1c   :  { %170 = vmatpush.msra.mxu1 %v161_v21  ;;  %245 = vmatpush.msra.mxu2 %v240_v6  ;;  %v232_v21 = vld [vmem:[#allocation7 + $0x38] sm:$0xff] }
  0x1d   :  { %98 = vmatpush.msra.mxu0 %v83_v7  ;;  %v239_v7 = vld [vmem:[#allocation7 + $0x70] sm:$0xff] }
  0x1e   :  { %171 = vmatpush.msra.mxu1 %v160_v22  ;;  %246 = vmatpush.msra.mxu2 %v239_v7 }
  0x1f   :  { %99 = vmatpush.msra.mxu0 %v82_v8  ;;  %v238_v8 = vld [vmem:[#allocation7 + $0x68] sm:$0xff] }
  0x20   :  { %172 = vmatpush.msra.mxu1 %v159_v26  ;;  %247 = vmatpush.msra.mxu2 %v238_v8 }
  0x21   :  { %100 = vmatpush.msra.mxu0 %v81_v9  ;;  %v237_v9 = vld [vmem:[#allocation7 + $0x60] sm:$0xff] }
  0x22   :  { %173 = vmatpush.msra.mxu1 %v158_v29  ;;  %248 = vmatpush.msra.mxu2 %v237_v9 }
  0x23   :  { %101 = vmatpush.msra.mxu0 %v80_v10  ;;  %v236_v10 = vld [vmem:[#allocation7 + $0x58] sm:$0xff] }
  0x24   :  { %174 = vmatpush.msra.mxu1 %v157_v32  ;;  %249 = vmatpush.msra.mxu2 %v236_v10 }
  0x25   :  { %102 = vmatpush.msra.mxu0 %v79_v11  ;;  %v235_v11 = vld [vmem:[#allocation7 + $0x50] sm:$0xff] }
  0x26   :  { %175 = vmatpush.msra.mxu1 %v156_v35  ;;  %250 = vmatpush.msra.mxu2 %v235_v11 }
  0x27   :  { %103 = vmatpush.msra.mxu0 %v78_v12 }
  0x28   :  { %176 = vmatpush.msra.mxu1 %v155_v38 }
  0x29   :  { %104 = vmatpush.msra.mxu0 %v77_v13 }
  0x2a   :  { %177 = vmatpush.msra.mxu1 %v154_v41 }
  0x2b   :  { %105 = vmatpush.msra.mxu0 %v76_v14 }
  0x2c   :  { %178 = vmatpush.msra.mxu1 %v153_v44 }
  0x2d   :  { %106 = vmatpush.msra.mxu0 %v75_v15  ;;  %v234_v15 = vld [vmem:[#allocation7 + $0x48] sm:$0xff] }
  0x2e   :  { %107 = vmatmul.f32.vlgmr.msra.gmra.mxu0 %v74_v16  ;;  %179 = vmatpush.msra.mxu1 %v152_v45 }
  0x2f   :  { %251 = vmatpush.msra.mxu2 %v234_v15 }
  0x30   :  { %180 = vmatpush.msra.mxu1 %v151_v48 }
  0x31   :  { %252 = vmatpush.msra.mxu2 %v233_v18 }
  0x32   :  { %181 = vmatpush.msra.mxu1 %v150_v50 }
  0x33   :  { %253 = vmatpush.msra.mxu2 %v232_v21 }
  0xab   :  { %v108_v23 = vpop.f32.mrf.mxu0 }
  0xac   :  { %v111_v24 = vrot.slane %v108_v23, 4  ;;  %v118_v25 = vmul.f32 %v108_v23, %v108_v23 }
  0xae   :  { %v112_v27 = vadd.f32 %v111_v24, %v108_v23  ;;  %v119_v28 = vrot.slane %v118_v25, 4  ;;  %v231_v24 = vld [vmem:[#allocation7 + $0x30] sm:$0xff] }
  0xaf   :  { %254 = vmatpush.msra.mxu2 %v231_v24 }
  0xb0   :  { %v113_v30 = vrot.slane %v112_v27, 2  ;;  %v120_v31 = vadd.f32 %v119_v28, %v118_v25 }
  0xb2   :  { %v114_v33 = vadd.f32 %v113_v30, %v112_v27  ;;  %v121_v34 = vrot.slane %v120_v31, 2  ;;  %v230_v27 = vld [vmem:[#allocation7 + $0x28] sm:$0xff]  ;;  %v229_v30 = vld [vmem:[#allocation7 + $0x20] sm:$0xff] }
  0xb3   :  { %255 = vmatpush.msra.mxu2 %v230_v27 }
  0xb4   :  { %v115_v36 = vrot.slane %v114_v33, 1  ;;  %v122_v37 = vadd.f32 %v121_v34, %v120_v31  ;;  %v227_v34 = vld [vmem:[#allocation7 + $0x10] sm:$0xff] }
  0xb5   :  { %256 = vmatpush.msra.mxu2 %v229_v30 }
  0xb6   :  { %v116_v39 = vadd.f32 %v115_v36, %v114_v33  ;;  %v123_v40 = vrot.slane %v122_v37, 1  ;;  %v228_v33 = vld [vmem:[#allocation7 + $0x18] sm:$0xff] }
  0xb7   :  { %257 = vmatpush.msra.mxu2 %v228_v33 }
  0xb8   :  { %v117_v42 = vmul.f32 0.125, %v116_v39  ;;  %v124_v43 = vadd.f32 %v123_v40, %v122_v37  ;;  %v226_v37 = vld [vmem:[#allocation7 + $0x8] sm:$0xff]  ;;  %v225_v39 = vld [vmem:[#allocation7] sm:$0xff] }
  0xb9   :  { %258 = vmatpush.msra.mxu2 %v227_v34 }
  0xba   :  { %v125_v46 = vmul.f32 0.125, %v124_v43  ;;  %v126_v47 = vmul.f32 %v117_v42, %v117_v42 }
  0xbb   :  { %259 = vmatpush.msra.mxu2 %v226_v37 }
  0xbc   :  { %v127_v49 = vsub.f32 %v125_v46, %v126_v47  ;;  %v204_v47 = vld [vmem:[%s477_s4] sm:$0x1] }
  0xbd   :  { %260 = vmatpush.msra.mxu2 %v225_v39 }
  0xbe   :  { %v128_v51 = vmax.f32 %v127_v49, 0.0 }
  0xc0   :  { %v130_v52 = vadd.f32 1e-05, %v128_v51  ;;  %v217_v51 = vld [vmem:[%s477_s4 + $0x1] sm:$0x1] }
  0xc2   :  { %291 = vrsqrt.f32 %v130_v52  ;;  %vm137_vm1 = vweird.f32 %v130_v52 }
  0xc8   :  { %v292_v53 = vpop.eup %291 }
  0xc9   :  { %v132_v54 = vmul.f32 %v292_v53, %v130_v52  ;;  %vm138_vm0 = vweird.f32 %v292_v53 }
  0xca   :  { %vm139_vm2 = vmor %vm137_vm1, %vm138_vm0 }
  0xcb   :  { %v133_v55 = vmul.f32 %v292_v53, %v132_v54 }
  0xcd   :  { %v134_v56 = vmul.f32 0.5, %v133_v55 }
  0xcf   :  { %v135_v57 = vsub.f32 1.5, %v134_v56 }
  0xd1   :  { %v136_v59 = vmul.f32 %v292_v53, %v135_v57 }
  0xd3   :  { %v140_v60 = vsel %vm139_vm2, %v292_v53, %v136_v59  ;;  %v290_v59 = vld [vmem:[%s479_s6] ss:$0 sm:$0xff] }
  0xd4   :  { %v141_v61 = vmul.f32 %v140_v60, %v129_v58 }
  0xd6   :  { %v145_v63 = vperm.slane %v141_v61, 0  ;;  %v143_v0 = vmul.f32 %v141_v61, %v117_v42 }
  0xd8   :  { %v144_v1 = vsub.f32 %v142_v62, %v143_v0  ;;  %v146_v2 = vmul.f32 %v145_v63, %v108_v23 }
  0xda   :  { %v147_v3 = vperm.slane %v144_v1, 0 }
  0xdc   :  { %v148_v4 = vadd.f32 %v147_v3, %v146_v2 }
  0xde   :  { %v149_v5 = vmax.f32 %v148_v4, 0.0 }
  0xe0   :  { %182 = vmatmul.f32.vlgmr.msra.gmra.mxu1 %v149_v5 }
 0x15d   :  { %v183_v12 = vpop.f32.mrf.mxu1 }
 0x15e   :  { %v186_v13 = vrot.slane %v183_v12, 4  ;;  %v193_v14 = vmul.f32 %v183_v12, %v183_v12 }
 0x160   :  { %v187_v16 = vadd.f32 %v186_v13, %v183_v12  ;;  %v194_v17 = vrot.slane %v193_v14, 4 }
 0x162   :  { %v188_v19 = vrot.slane %v187_v16, 2  ;;  %v195_v20 = vadd.f32 %v194_v17, %v193_v14 }
 0x164   :  { %v189_v22 = vadd.f32 %v188_v19, %v187_v16  ;;  %v196_v23 = vrot.slane %v195_v20, 2 }
 0x166   :  { %v190_v25 = vrot.slane %v189_v22, 1  ;;  %v197_v26 = vadd.f32 %v196_v23, %v195_v20 }
 0x168   :  { %v191_v28 = vadd.f32 %v190_v25, %v189_v22  ;;  %v198_v29 = vrot.slane %v197_v26, 1 }
 0x16a   :  { %v192_v31 = vmul.f32 0.125, %v191_v28  ;;  %v199_v32 = vadd.f32 %v198_v29, %v197_v26 }
 0x16c   :  { %v200_v35 = vmul.f32 0.125, %v199_v32  ;;  %v201_v36 = vmul.f32 %v192_v31, %v192_v31 }
 0x16e   :  { %v202_v38 = vsub.f32 %v200_v35, %v201_v36 }
 0x170   :  { %v203_v40 = vmax.f32 %v202_v38, 0.0 }
 0x172   :  { %v205_v41 = vadd.f32 1e-05, %v203_v40 }
 0x174   :  { %293 = vrsqrt.f32 %v205_v41  ;;  %vm212_vm4 = vweird.f32 %v205_v41 }
 0x17a   :  { %v294_v42 = vpop.eup %293 }
 0x17b   :  { %v207_v43 = vmul.f32 %v294_v42, %v205_v41  ;;  %vm213_vm3 = vweird.f32 %v294_v42 }
 0x17c   :  { %vm214_vm5 = vmor %vm212_vm4, %vm213_vm3 }
 0x17d   :  { %v208_v44 = vmul.f32 %v294_v42, %v207_v43 }
 0x17f   :  { %v209_v45 = vmul.f32 0.5, %v208_v44 }
 0x181   :  { %v210_v46 = vsub.f32 1.5, %v209_v45 }
 0x183   :  { %v211_v48 = vmul.f32 %v294_v42, %v210_v46 }
 0x185   :  { %v215_v49 = vsel %vm214_vm5, %v294_v42, %v211_v48 }
 0x186   :  { %v216_v50 = vmul.f32 %v215_v49, %v204_v47 }
 0x188   :  { %v220_v52 = vperm.slane %v216_v50, 0  ;;  %v218_v53 = vmul.f32 %v216_v50, %v192_v31 }
 0x18a   :  { %v219_v54 = vsub.f32 %v217_v51, %v218_v53  ;;  %v221_v55 = vmul.f32 %v220_v52, %v183_v12 }
 0x18c   :  { %v222_v56 = vperm.slane %v219_v54, 0 }
 0x18e   :  { %v223_v57 = vadd.f32 %v222_v56, %v221_v55 }
 0x190   :  { %v224_v58 = vmax.f32 %v223_v57, 0.0 }
 0x192   :  { %261 = vmatmul.f32.vlgmr.msra.gmra.mxu2 %v224_v58 }
 0x215   :  { %v262_v60 = vpop.f32.mrf.mxu2 }
 0x216   :  { %v263_v61 = vadd.f32 %v290_v59, %v262_v60 }
 0x218   :  { %265 = vst [vmem:[#allocation8] sm:$0xff] %v263_v61 }
 0x219   :  { %276 = dma.vmem_to_hbm [thread:$0]  %s272_s26, 128, %s274_s29, [#allocation4]  }
 0x21a   :  { %395 = dma.done.wait [#allocation4], 128  }
 0x21b   :  { %396 = vsyncadd [#allocation4], 4294967168 }
 0x21c   :  { %281 = vsyncpa [#allocation3], 1 }
 0x21d   :  { %282 = vsyncpa [#allocation6], 1 }
 0x21e   :  { %283 = vsyncpa [#allocation4], 1 }

</bundles_post_ra>
